<compile_context>
chip_gen: v5e
topology: v5e:2x2
jax: 0.10.0
libtpu: 0.0.40
codegen_flags: <defaults>
</compile_context>

<pallas_src>
import numpy as np
import jax
import jax.numpy as jnp
from jax.experimental import pallas as pl
from jax.experimental.pallas import tpu as pltpu

MLP_ALIGNMENT = 16

# Module defaults from the spec:
# MLP_Native(n_input_dims=3, n_output_dims=1, bias=False, n_hidden_layers=3,
#            n_neurons=64, activation='ReLU', output_activation='None')
N_INPUT_DIMS = 3
N_OUTPUT_DIMS = 1
N_HIDDEN_LAYERS = 3
N_NEURONS = 64
N_LAST = (N_OUTPUT_DIMS + MLP_ALIGNMENT - 1) // MLP_ALIGNMENT * MLP_ALIGNMENT   # 16

TN = 256        # points per grid step (multiple of 8); amortizes per-step overhead


def _make_mlp_kernel(n_in, n_hidden_mats):
    """Kernel over one (TN, n_in) tile of points; whole MLP evaluated in VMEM."""
    def kernel(x_ref, *refs):
        w_first = refs[0]                      # (n_in, N_NEURONS)
        w_hidden = refs[1:1 + n_hidden_mats]   # each (N_NEURONS, N_NEURONS)
        w_last = refs[1 + n_hidden_mats]       # (N_NEURONS, N_LAST)
        o_ref = refs[2 + n_hidden_mats]        # (TN, N_LAST)

        x = x_ref[...]                         # (TN, n_in) f32
        wf = w_first[...]                      # (n_in, N_NEURONS) f32

        # First layer: n_in is tiny (3), so do it as n_in broadcast-FMAs on the VPU
        # rather than a K=3 MXU matmul.
        h = x[:, 0:1] * wf[0:1, :]
        for d in range(1, n_in):
            h = h + x[:, d:d + 1] * wf[d:d + 1, :]
        h = jnp.maximum(h, 0.0)                # ReLU (activation='ReLU')

        # Hidden layers: (TN, 64) @ (64, 64) on the MXU with f32 accumulation.
        for w_ref in w_hidden:
            h = jnp.dot(h, w_ref[...], preferred_element_type=jnp.float32)
            h = jnp.maximum(h, 0.0)

        # Last layer; output_activation='None' -> identity.  Store the full padded
        # (TN, N_LAST=16) slab (full output width, so the block spec is legal); the
        # [..., :n_output_dims] slice happens in the wrapper.
        o_ref[...] = jnp.dot(h, w_last[...],
                             preferred_element_type=jnp.float32).astype(o_ref.dtype)
    return kernel


def mlp_native_forward(x, w_first, w_hidden, w_last):
    """Forward pass.  Weights are in PyTorch nn.Linear layout (out_features, in_features).

    x: (..., n_input_dims) -> returns (..., n_output_dims).
    """
    orig_shape = x.shape
    x2 = x.reshape(-1, orig_shape[-1]).astype(jnp.float32)
    n, n_in = x2.shape
    assert n_in == w_first.shape[1]

    # Transpose once to (in, out) so the kernel computes x @ W^T as x @ Wt.
    w_first_t = jnp.transpose(w_first).astype(jnp.float32)          # (n_in, 64)
    w_hidden_t = tuple(jnp.transpose(w).astype(jnp.float32) for w in w_hidden)
    w_last_t = jnp.transpose(w_last).astype(jnp.float32)            # (64, N_LAST)

    n_pad = (n + TN - 1) // TN * TN
    if n_pad != n:
        x2 = jnp.pad(x2, ((0, n_pad - n), (0, 0)))

    kernel = _make_mlp_kernel(n_in, len(w_hidden_t))

    in_specs = [pl.BlockSpec((TN, n_in), lambda i: (i, 0)),
                pl.BlockSpec(w_first_t.shape, lambda i: (0, 0))]
    for w in w_hidden_t:
        in_specs.append(pl.BlockSpec(w.shape, lambda i: (0, 0)))
    in_specs.append(pl.BlockSpec(w_last_t.shape, lambda i: (0, 0)))

    n_last = w_last_t.shape[1]
    out = pl.pallas_call(
        kernel,
        out_shape=jax.ShapeDtypeStruct((n_pad, n_last), jnp.float32),
        grid=(n_pad // TN,),
        in_specs=in_specs,
        out_specs=pl.BlockSpec((TN, n_last), lambda i: (i, 0)),
        compiler_params=pltpu.CompilerParams(
            dimension_semantics=("parallel",)),   # v7x: shard point tiles across 2 TCs
    )(x2, w_first_t, *w_hidden_t, w_last_t)

    out = out[:n, :N_OUTPUT_DIMS]
    return out.reshape(orig_shape[:-1] + (N_OUTPUT_DIMS,))


if __name__ == "__main__":
    key = jax.random.PRNGKey(0)
    kx, k1, k2, k3, k4 = jax.random.split(key, 5)

    N = 512   # 2 grid steps of TN=256 -> both v7x TensorCores get work
    x = jax.random.uniform(kx, (N, N_INPUT_DIMS), jnp.float32, minval=-1.0, maxval=1.0)

    def init_linear(k, out_f, in_f):
        bound = 1.0 / np.sqrt(in_f)   # nn.Linear-style uniform bound, deterministic
        return jax.random.uniform(k, (out_f, in_f), jnp.float32,
                                  minval=-bound, maxval=bound)

    w_first = init_linear(k1, N_NEURONS, N_INPUT_DIMS)
    w_hidden = (init_linear(k2, N_NEURONS, N_NEURONS),
                init_linear(k3, N_NEURONS, N_NEURONS))      # n_hidden_layers - 1 = 2
    w_last = init_linear(k4, N_LAST, N_NEURONS)

    fwd = jax.jit(mlp_native_forward)
    out = jax.block_until_ready(fwd(x, w_first, w_hidden, w_last))

    # float64 numpy reference mirroring the PyTorch forward exactly.
    def reference_np(x_, wf_, wh_, wl_):
        h = np.asarray(x_, np.float64)
        h = np.maximum(h @ np.asarray(wf_, np.float64).T, 0.0)
        for w in wh_:
            h = np.maximum(h @ np.asarray(w, np.float64).T, 0.0)
        o = h @ np.asarray(wl_, np.float64).T
        return o[..., :N_OUTPUT_DIMS]

    ref = reference_np(x, w_first, w_hidden, w_last)
    out_np = np.asarray(out)
    assert out_np.shape == (N, N_OUTPUT_DIMS) and out_np.dtype == np.float32
    assert np.all(np.isfinite(out_np))
    # Tolerance accommodates possible bf16-pass MXU evaluation of f32 matmuls;
    # structural errors (wrong transpose / missing ReLU) would be orders larger.
    np.testing.assert_allclose(out_np, ref, rtol=1e-2, atol=1e-2)

    print("KERNEL_OK")
</pallas_src>

<mosaic_0001>
module attributes {stable_mosaic.version = 11 : i64} {
  func.func @kernel(%arg0: i32, %arg1: memref<256x3xf32, #tpu.memory_space<vmem>>, %arg2: memref<3x64xf32, #tpu.memory_space<vmem>>, %arg3: memref<64x64xf32, #tpu.memory_space<vmem>>, %arg4: memref<64x64xf32, #tpu.memory_space<vmem>>, %arg5: memref<64x16xf32, #tpu.memory_space<vmem>>, %arg6: memref<256x16xf32, #tpu.memory_space<vmem>>) attributes {dimension_semantics = [#tpu.dimension_semantics<parallel>], iteration_bounds = array<i64: 2>, scalar_prefetch = 0 : i64, scratch_operands = 0 : i64, tpu.core_type = #tpu.core_type<tc>, window_params = [{transform_indices = @transform_0, window_bounds = array<i64: 256, 3>}, {pipeline_mode = #tpu.pipeline_mode<synchronous>, transform_indices = @transform_1, window_bounds = array<i64: 3, 64>}, {pipeline_mode = #tpu.pipeline_mode<synchronous>, transform_indices = @transform_2, window_bounds = array<i64: 64, 64>}, {pipeline_mode = #tpu.pipeline_mode<synchronous>, transform_indices = @transform_3, window_bounds = array<i64: 64, 64>}, {pipeline_mode = #tpu.pipeline_mode<synchronous>, transform_indices = @transform_4, window_bounds = array<i64: 64, 16>}, {transform_indices = @transform_5, window_bounds = array<i64: 256, 16>}]} {
    %c0 = arith.constant 0 : index
    %c0_0 = arith.constant 0 : index
    %0 = vector.load %arg1[%c0, %c0_0] : memref<256x3xf32, #tpu.memory_space<vmem>>, vector<256x3xf32>
    %c0_1 = arith.constant 0 : index
    %c0_2 = arith.constant 0 : index
    %1 = vector.load %arg2[%c0_1, %c0_2] : memref<3x64xf32, #tpu.memory_space<vmem>>, vector<3x64xf32>
    %2 = vector.extract_strided_slice %0 {offsets = [0, 0], sizes = [256, 1], strides = [1, 1]} : vector<256x3xf32> to vector<256x1xf32>
    %3 = vector.extract_strided_slice %1 {offsets = [0, 0], sizes = [1, 64], strides = [1, 1]} : vector<3x64xf32> to vector<1x64xf32>
    %4 = vector.broadcast %2 : vector<256x1xf32> to vector<256x64xf32>
    %5 = vector.broadcast %3 : vector<1x64xf32> to vector<256x64xf32>
    %6 = arith.mulf %4, %5 : vector<256x64xf32>
    %7 = vector.extract_strided_slice %0 {offsets = [0, 1], sizes = [256, 1], strides = [1, 1]} : vector<256x3xf32> to vector<256x1xf32>
    %8 = vector.extract_strided_slice %1 {offsets = [1, 0], sizes = [1, 64], strides = [1, 1]} : vector<3x64xf32> to vector<1x64xf32>
    %9 = vector.broadcast %7 : vector<256x1xf32> to vector<256x64xf32>
    %10 = vector.broadcast %8 : vector<1x64xf32> to vector<256x64xf32>
    %11 = arith.mulf %9, %10 : vector<256x64xf32>
    %12 = arith.addf %6, %11 : vector<256x64xf32>
    %13 = vector.extract_strided_slice %0 {offsets = [0, 2], sizes = [256, 1], strides = [1, 1]} : vector<256x3xf32> to vector<256x1xf32>
    %14 = vector.extract_strided_slice %1 {offsets = [2, 0], sizes = [1, 64], strides = [1, 1]} : vector<3x64xf32> to vector<1x64xf32>
    %15 = vector.broadcast %13 : vector<256x1xf32> to vector<256x64xf32>
    %16 = vector.broadcast %14 : vector<1x64xf32> to vector<256x64xf32>
    %17 = arith.mulf %15, %16 : vector<256x64xf32>
    %18 = arith.addf %12, %17 : vector<256x64xf32>
    %cst = arith.constant 0.000000e+00 : f32
    %19 = vector.broadcast %cst : f32 to vector<256x64xf32>
    %20 = arith.maximumf %18, %19 : vector<256x64xf32>
    %c0_3 = arith.constant 0 : index
    %c0_4 = arith.constant 0 : index
    %21 = vector.load %arg3[%c0_3, %c0_4] : memref<64x64xf32, #tpu.memory_space<vmem>>, vector<64x64xf32>
    %cst_5 = arith.constant dense<0.000000e+00> : vector<256x64xf32>
    %22 = tpu.matmul %20, %21, %cst_5 {dimension_numbers = #tpu.dot_dimension_numbers<[1], [0], [0], [1], [0, 0, 1, 1], [], []>} : vector<256x64xf32>, vector<64x64xf32>, vector<256x64xf32> -> vector<256x64xf32>
    %cst_6 = arith.constant 0.000000e+00 : f32
    %23 = vector.broadcast %cst_6 : f32 to vector<256x64xf32>
    %24 = arith.maximumf %22, %23 : vector<256x64xf32>
    %c0_7 = arith.constant 0 : index
    %c0_8 = arith.constant 0 : index
    %25 = vector.load %arg4[%c0_7, %c0_8] : memref<64x64xf32, #tpu.memory_space<vmem>>, vector<64x64xf32>
    %cst_9 = arith.constant dense<0.000000e+00> : vector<256x64xf32>
    %26 = tpu.matmul %24, %25, %cst_9 {dimension_numbers = #tpu.dot_dimension_numbers<[1], [0], [0], [1], [0, 0, 1, 1], [], []>} : vector<256x64xf32>, vector<64x64xf32>, vector<256x64xf32> -> vector<256x64xf32>
    %cst_10 = arith.constant 0.000000e+00 : f32
    %27 = vector.broadcast %cst_10 : f32 to vector<256x64xf32>
    %28 = arith.maximumf %26, %27 : vector<256x64xf32>
    %c0_11 = arith.constant 0 : index
    %c0_12 = arith.constant 0 : index
    %29 = vector.load %arg5[%c0_11, %c0_12] : memref<64x16xf32, #tpu.memory_space<vmem>>, vector<64x16xf32>
    %cst_13 = arith.constant dense<0.000000e+00> : vector<256x16xf32>
    %30 = tpu.matmul %28, %29, %cst_13 {dimension_numbers = #tpu.dot_dimension_numbers<[1], [0], [0], [1], [0, 0, 1, 1], [], []>} : vector<256x64xf32>, vector<64x16xf32>, vector<256x16xf32> -> vector<256x16xf32>
    %c0_14 = arith.constant 0 : index
    %c0_15 = arith.constant 0 : index
    %31 = vector.load %arg6[%c0_14, %c0_15] : memref<256x16xf32, #tpu.memory_space<vmem>>, vector<256x16xf32>
    tpu.vector_store %arg6[%c0_14, %c0_15], %30 {strides = array<i32>} : memref<256x16xf32, #tpu.memory_space<vmem>>, vector<256x16xf32>,
    return
  }
  func.func @transform_0(%arg0: i32) -> (i32, i32) {
    %c0_i32 = arith.constant 0 : i32
    %c0_i32_0 = arith.constant 0 : i32
    return %arg0, %c0_i32 : i32, i32
  }
  func.func @transform_1(%arg0: i32) -> (i32, i32) {
    %c0_i32 = arith.constant 0 : i32
    %c0_i32_0 = arith.constant 0 : i32
    %c0_i32_1 = arith.constant 0 : i32
    return %c0_i32, %c0_i32_0 : i32, i32
  }
  func.func @transform_2(%arg0: i32) -> (i32, i32) {
    %c0_i32 = arith.constant 0 : i32
    %c0_i32_0 = arith.constant 0 : i32
    %c0_i32_1 = arith.constant 0 : i32
    return %c0_i32, %c0_i32_0 : i32, i32
  }
  func.func @transform_3(%arg0: i32) -> (i32, i32) {
    %c0_i32 = arith.constant 0 : i32
    %c0_i32_0 = arith.constant 0 : i32
    %c0_i32_1 = arith.constant 0 : i32
    return %c0_i32, %c0_i32_0 : i32, i32
  }
  func.func @transform_4(%arg0: i32) -> (i32, i32) {
    %c0_i32 = arith.constant 0 : i32
    %c0_i32_0 = arith.constant 0 : i32
    %c0_i32_1 = arith.constant 0 : i32
    return %c0_i32, %c0_i32_0 : i32, i32
  }
  func.func @transform_5(%arg0: i32) -> (i32, i32) {
    %c0_i32 = arith.constant 0 : i32
    %c0_i32_0 = arith.constant 0 : i32
    return %arg0, %c0_i32 : i32, i32
  }
}

</mosaic_0001>

<bundles_post_ra>
// kernel: mlp_native_forward.1
= control target key start
LH: loop header
LB: loop body
LE: loop exit
PB: predicated region body
PF: predicated region fallthrough
CT: control target
= control target key end

     0   :  { %s1910_s18 = smov 0   ;;  %s2429_s0 = inlined_call_operand.vmem [shape: f32[512,3], index: 0, kind: input, shape index: {}]   ;;  %s2430_s1 = inlined_call_operand.vmem [shape: f32[3,64], index: 1, kind: input, shape index: {}]   ;;  %s2431_s2 = inlined_call_operand.vmem [shape: f32[64,64], index: 2, kind: input, shape index: {}]   ;;  %s2432_s3 = inlined_call_operand.vmem [shape: f32[64,64], index: 3, kind: input, shape index: {}]   ;;  %s2433_s4 = inlined_call_operand.vmem [shape: f32[64,16], index: 4, kind: input, shape index: {}]   ;;  %s2434_s5 = inlined_call_operand.vmem [shape: f32[512,16], index: 5, kind: output, shape index: {}]  }
   0x1 LB: > { %s1677_s19 = sadd.s32 4294967295, %s1875_s18   ;;  %p1681_p0 = scmp.ge.s32.totalorder %s1875_s18, 1  ;;  %s1875_s18 = sphi %s1910_s18, %s15_s18  }
   0x2   : > { %p188_p1 = scmp.lt.s32.totalorder %s1875_s18, 3 }
   0x4   : > { %p189_p2 = pnand %p1681_p0, %p188_p1 }
   0x5   : > { %s1682_s20 = sshll.u32 (!%p189_p2), %s1677_s19, 5 }
   0x6   : > { %192 = sbr.rel (%p189_p2) target bundleno = 842 (0x34a), region = 40  ;;  %p217_p3 = scmp.lt.s32.totalorder (!%p189_p2), %s1682_s20, 63 }
   0xb   : > { %v1877_v0 = vmov 2   ;;  %v1878_v1 = vmov 1   ;;  %v1879_v2 = vmov 0   ;;  %s2436_s20 = smov (!%p217_p3, %s1682_s20), 63  ;;  %v879_v18 = vld [vmem:[%s2431_s2 + $0x38] sm:$0xff]  ;;  %v878_v19 = vld [vmem:[%s2431_s2 + $0x30] sm:$0xff] }
   0xc   : > { %1820 = vset.pattern.permute.xlu1 %v1877_v0  ;;  %1822 = vset.pattern.permute.xlu2 %v1878_v1  ;;  %s1683_s21 = sshll.u32 %s2436_s20, 3  ;;  %v877_v20 = vld [vmem:[%s2431_s2 + $0x28] sm:$0xff]  ;;  %v876_v22 = vld [vmem:[%s2431_s2 + $0x20] sm:$0xff]  ;;  %v875_v23 = vld [vmem:[%s2431_s2 + $0x18] sm:$0xff]  ;;  %vm880_vm0 = vcmask 523264   ;;  %vm1588_vm1 = vcmask 130048  }
   0xd   : > { %1819 = vset.pattern.permute.xlu0 %v1879_v2  ;;  %s1929_s24 = scalar_lea.vmem %s2429_s0, %s1683_s21  ;;  %985 = vmatpush.msra.mxu0 %v879_v18  ;;  %v874_v24 = vld [vmem:[%s2431_s2 + $0x10] sm:$0xff]  ;;  %v873_v26 = vld [vmem:[%s2431_s2 + $0x8] sm:$0xff]  ;;  %v872_v27 = vld [vmem:[%s2431_s2] sm:$0xff]  ;;  %s2338_s9 = scalar_lea.vmem %s2434_s5, %s1683_s21 }
   0xe   : > { %v229_v3 = vld [vmem:[%s1929_s24 + $0x8] sm:$0xff]  ;;  %v228_v4 = vld [vmem:[%s1929_s24] sm:$0xff]  ;;  %v230_v5 = vld [vmem:[%s1929_s24 + $0x10] sm:$0xff]  ;;  %1784 = vmatpush.msra.mxu3 %v879_v18 }
   0xf   : > { %459 = vperm.xlu2 %1822, %v229_v3   ;;  %648 = vperm.xlu1 %1820, %v228_v4   ;;  %v231_v6 = vld [vmem:[%s1929_s24 + $0x18] sm:$0xff]  ;;  %v232_v7 = vld [vmem:[%s1929_s24 + $0x20] sm:$0xff]  ;;  %v234_v8 = vld [vmem:[%s1929_s24 + $0x30] sm:$0xff] }
  0x10   : > { %263 = vperm.xlu0 %1819, %v228_v4   ;;  %v233_v9 = vld [vmem:[%s1929_s24 + $0x28] sm:$0xff]  ;;  %v1947_v10 = vld [vmem:[%s1929_s24 + $0x58] sm:$0xff]  ;;  %v1955_v12 = vld [vmem:[%s1929_s24 + $0x60] sm:$0xff]  ;;  %986 = vmatpush.msra.mxu0 %v878_v19 }
  0x11   : > { %v235_v11 = vld [vmem:[%s1929_s24 + $0x38] sm:$0xff]  ;;  %v1959_v13 = vld [vmem:[%s1929_s24 + $0xc8] sm:$0xff]  ;;  %v236_v14 = vld [vmem:[%s1929_s24 + $0x40] sm:$0xff]  ;;  %1785 = vmatpush.msra.mxu3 %v878_v19 }
  0x12   : > { %v237_v15 = vld [vmem:[%s1929_s24 + $0x48] sm:$0xff]  ;;  %v238_v17 = vld [vmem:[%s1929_s24 + $0x50] sm:$0xff]  ;;  %987 = vmatpush.msra.mxu0 %v877_v20  ;;  %v2014_v33 = vld [vmem:[%s1929_s24 + $0x98] sm:$0xff] }
  0x13   : > { %1786 = vmatpush.msra.mxu3 %v877_v20  ;;  %v1995_v25 = vld [vmem:[%s1929_s24 + $0x70] sm:$0xff]  ;;  %v241_v36 = vld [vmem:[%s1929_s24 + $0x68] sm:$0xff]  ;;  %v260_v38 = vld [vmem:[%s2430_s1] sm:$0x7] }
  0x14   : > { %988 = vmatpush.msra.mxu0 %v876_v22  ;;  %v2007_v29 = vld [vmem:[%s1929_s24 + $0xd0] sm:$0xff]  ;;  %v243_v39 = vld [vmem:[%s1929_s24 + $0x78] sm:$0xff]  ;;  %v2024_v40 = vperm.slane %v260_v38, 0  ;;  %v2026_v41 = vperm.slane %v260_v38, 1  ;;  %v2028_v42 = vperm.slane %v260_v38, 2  ;;  %v252_v57 = vld [vmem:[%s1929_s24 + $0xc0] sm:$0xff] }
  0x15   : > { %1787 = vmatpush.msra.mxu3 %v876_v22 }
  0x16   : > { %989 = vmatpush.msra.mxu0 %v875_v23 }
  0x17   : > { %1823 = vset.pattern.permute.xlu2 %v1877_v0  ;;  %1821 = vset.pattern.permute.xlu1 %v1879_v2 }
  0x18   : > { %1825 = vset.pattern.permute.xlu0 %v1877_v0  ;;  %652 = vperm.xlu2 %1823, %v229_v3  }
  0x19   : > { %268 = vperm.xlu1 %1821, %v229_v3   ;;  %656 = vperm.xlu0 %1825, %v230_v5  }
  0x1a   : > { %1788 = vmatpush.msra.mxu3 %v875_v23  ;;  %990 = vmatpush.msra.mxu0 %v874_v24 }
  0x1c   : > { %1789 = vmatpush.msra.mxu3 %v874_v24  ;;  %991 = vmatpush.msra.mxu0 %v873_v26 }
  0x1e   : > { %1790 = vmatpush.msra.mxu3 %v873_v26  ;;  %992 = vmatpush.msra.mxu0 %v872_v27 }
  0x20   : > { %1824 = vset.pattern.permute.xlu2 %v1878_v1  ;;  %1791 = vmatpush.msra.mxu3 %v872_v27 }
  0x21   : > { %273 = vperm.xlu1 %1821, %v230_v5   ;;  %1826 = vset.pattern.permute.xlu0 %v1878_v1 }
  0x22   : > { %463 = vperm.xlu2 %1824, %v230_v5   ;;  %455 = vperm.xlu0 %1826, %v228_v4  }
  0x29   : > { %278 = vperm.xlu1 %1821, %v231_v6  }
  0x2a   : > { %467 = vperm.xlu2 %1824, %v231_v6   ;;  %471 = vperm.xlu0 %1826, %v232_v7  }
  0x31   : > { %1827 = vset.pattern.permute.xlu1 %v1877_v0 }
  0x32   : > { %1828 = vset.pattern.permute.xlu2 %v1879_v2  ;;  %660 = vperm.xlu1 %1827, %v231_v6  }
  0x33   : > { %283 = vperm.xlu2 %1828, %v232_v7   ;;  %1831 = vset.pattern.permute.xlu0 %v1879_v2 }
  0x34   : > { %293 = vperm.xlu0 %1831, %v234_v8  }
  0x3a   : > { %664 = vperm.xlu1 %1827, %v232_v7  }
  0x3b   : > { %288 = vperm.xlu2 %1828, %v233_v9  }
  0x3c   : > { %318 = vperm.xlu0 %1831, %v1947_v10  }
  0x42   : > { %1829 = vset.pattern.permute.xlu1 %v1878_v1 }
  0x43   : > { %1830 = vset.pattern.permute.xlu2 %v1877_v0  ;;  %475 = vperm.xlu1 %1829, %v233_v9  }
  0x44   : > { %668 = vperm.xlu2 %1830, %v233_v9   ;;  %1838 = vset.pattern.permute.xlu0 %v1877_v0 }
  0x45   : > { %676 = vperm.xlu0 %1838, %v235_v11  }
  0x4b   : > { %479 = vperm.xlu1 %1829, %v234_v8  }
  0x4c   : > { %672 = vperm.xlu2 %1830, %v234_v8  }
  0x4d   : > { %696 = vperm.xlu0 %1838, %v1955_v12  }
  0x53   : > { %1832 = vset.pattern.permute.xlu1 %v1879_v2 }
  0x54   : > { %1833 = vset.pattern.permute.xlu2 %v1878_v1  ;;  %298 = vperm.xlu1 %1832, %v235_v11  }
  0x55   : > { %483 = vperm.xlu2 %1833, %v235_v11   ;;  %748 = vperm.xlu0 %1838, %v1959_v13  }
  0x5c   : > { %303 = vperm.xlu1 %1832, %v236_v14  }
  0x5d   : > { %487 = vperm.xlu2 %1833, %v236_v14   ;;  %1847 = vset.pattern.permute.xlu0 %v1878_v1 }
  0x5e   : > { %491 = vperm.xlu0 %1847, %v237_v15  }
  0x64   : > { %1834 = vset.pattern.permute.xlu1 %v1877_v0 }
  0x65   : > { %1835 = vset.pattern.permute.xlu2 %v1879_v2  ;;  %680 = vperm.xlu1 %1834, %v236_v14  }
  0x66   : > { %308 = vperm.xlu2 %1835, %v237_v15   ;;  %511 = vperm.xlu0 %1847, %v1995_v25  }
  0x69   : > { %v1969_v16 = vpop.permute.xlu2 %459 }
  0x6a   : > { %v584_v51 = vmul.f32 %v2026_v41, %v1969_v16 }
  0x6d   : > { %684 = vperm.xlu1 %1834, %v237_v15  }
  0x6e   : > { %313 = vperm.xlu2 %1835, %v238_v17   ;;  %559 = vperm.xlu0 %1847, %v2007_v29  }
  0x72   : > { %v1981_v21 = vpop.permute.xlu2 %652 }
  0x73   : > { %v777_v53 = vmul.f32 %v2028_v42, %v1981_v21 }
  0x75   : > { %1836 = vset.pattern.permute.xlu1 %v1878_v1 }
  0x76   : > { %1837 = vset.pattern.permute.xlu2 %v1877_v0  ;;  %495 = vperm.xlu1 %1836, %v238_v17  }
  0x77   : > { %688 = vperm.xlu2 %1837, %v238_v17   ;;  %531 = vperm.xlu0 %1847, %v2014_v33  }
  0x7c   : > { %v464_v28 = vpop.permute.xlu2 %463 }
  0x7d   : > { %v585_v59 = vmul.f32 %v2026_v41, %v464_v28 }
  0x7e   : > { %499 = vperm.xlu1 %1836, %v1947_v10  }
  0x7f   : > { %692 = vperm.xlu2 %1837, %v1947_v10   ;;  %1856 = vset.pattern.permute.xlu0 %v1879_v2 }
  0x80   : > { %338 = vperm.xlu0 %1856, %v243_v39  }
  0x81   : > { %v649_v30 = vpop.permute.xlu1 %648 }
  0x82   : > { %v264_v31 = vpop.permute.xlu0 %263  ;;  %v776_v48 = vmul.f32 %v2028_v42, %v649_v30 }
  0x83   : > { %v422_v43 = vmul.f32 %v2024_v40, %v264_v31 }
  0x84   : > { %v468_v32 = vpop.permute.xlu2 %467 }
  0x85   : > { %v586_v10 = vmul.f32 %v2026_v41, %v468_v32 }
  0x86   : > { %1839 = vset.pattern.permute.xlu1 %v1879_v2 }
  0x87   : > { %1840 = vset.pattern.permute.xlu2 %v1878_v1  ;;  %323 = vperm.xlu1 %1839, %v1955_v12  }
  0x88   : > { %503 = vperm.xlu2 %1840, %v1955_v12  }
  0x8b   : > { %v269_v34 = vpop.permute.xlu1 %268  ;;  %v657_v35 = vpop.permute.xlu0 %656 }
  0x8c   : > { %v423_v49 = vmul.f32 %v2024_v40, %v269_v34  ;;  %v778_v63 = vmul.f32 %v2028_v42, %v657_v35 }
  0x8d   : > { %v284_v37 = vpop.permute.xlu2 %283 }
  0x8e   : > { %v616_v54 = vadd.f32 %v584_v51, %v423_v49  ;;  %v426_v18 = vmul.f32 %v2024_v40, %v284_v37 }
  0x8f   : > { %328 = vperm.xlu1 %1839, %v241_v36  }
  0x90   : > { %507 = vperm.xlu2 %1840, %v241_v36   ;;  %v809_v61 = vadd.f32 %v777_v53, %v616_v54 }
  0x92   : > { %v841_v4 = vmax.f32 %v809_v61, 0.0  ;;  %v245_v61 = vld [vmem:[%s1929_s24 + $0x88] sm:$0xff] }
  0x93   : > { %v274_v44 = vpop.permute.xlu1 %273 }
  0x94   : > { %v456_v45 = vpop.permute.xlu0 %455  ;;  %v424_v60 = vmul.f32 %v2024_v40, %v274_v44 }
  0x95   : > { %v583_v46 = vmul.f32 %v2026_v41, %v456_v45  ;;  %v289_v47 = vpop.permute.xlu2 %288 }
  0x96   : > { %v617_v3 = vadd.f32 %v585_v59, %v424_v60  ;;  %v427_v28 = vmul.f32 %v2024_v40, %v289_v47 }
  0x97   : > { %v615_v50 = vadd.f32 %v583_v46, %v422_v43  ;;  %1841 = vset.pattern.permute.xlu1 %v1877_v0 }
  0x98   : > { %1842 = vset.pattern.permute.xlu2 %v1879_v2  ;;  %700 = vperm.xlu1 %1841, %v241_v36   ;;  %v810_v7 = vadd.f32 %v778_v63, %v617_v3  ;;  %v2069_v36 = vld [vmem:[%s1929_s24 + $0xd8] sm:$0xff] }
  0x99   : > { %333 = vperm.xlu2 %1842, %v1995_v25   ;;  %v808_v52 = vadd.f32 %v776_v48, %v615_v50  ;;  %398 = vperm.xlu0 %1856, %v2069_v36   ;;  %v2080_v48 = vld [vmem:[%s1929_s24 + $0xa0] sm:$0xff] }
  0x9a   : > { %v842_v12 = vmax.f32 %v810_v7, 0.0 }
  0x9b   : > { %v279_v55 = vpop.permute.xlu1 %278  ;;  %v840_v56 = vmax.f32 %v808_v52, 0.0 }
  0x9c   : > { %v472_v62 = vpop.permute.xlu0 %471  ;;  %v425_v9 = vmul.f32 %v2024_v40, %v279_v55 }
  0x9d   : > { %1686 = vmatmul.msk.f32.vlgmr.msra.gmra.mxu0 %vm880_vm0, %v840_v56  ;;  %v587_v19 = vmul.f32 %v2026_v41, %v472_v62 }
  0x9e   : > { %v669_v58 = vpop.permute.xlu2 %668  ;;  %v618_v15 = vadd.f32 %v586_v10, %v425_v9 }
  0x9f   : > { %v619_v23 = vadd.f32 %v587_v19, %v426_v18  ;;  %v781_v30 = vmul.f32 %v2028_v42, %v669_v58  ;;  %v246_v58 = vld [vmem:[%s1929_s24 + $0x90] sm:$0xff] }
  0xa0   : > { %704 = vperm.xlu1 %1841, %v1995_v25  }
  0xa1   : > { %383 = vperm.xlu2 %1842, %v252_v57   ;;  %363 = vperm.xlu0 %1856, %v2080_v48  }
  0xa4   : > { %v661_v5 = vpop.permute.xlu1 %660 }
  0xa5   : > { %1687 = vmatmul.msk.f32.gmra.mxu0 %vm880_vm0, %v841_v4  ;;  %v779_v11 = vmul.f32 %v2028_v42, %v661_v5 }
  0xa6   : > { %v673_v6 = vpop.permute.xlu2 %672  ;;  %v294_v8 = vpop.permute.xlu0 %293 }
  0xa7   : > { %v811_v16 = vadd.f32 %v779_v11, %v618_v15  ;;  %v428_v37 = vmul.f32 %v2024_v40, %v294_v8  ;;  %v782_v46 = vmul.f32 %v2028_v42, %v673_v6 }
  0xa8   : > { %1843 = vset.pattern.permute.xlu1 %v1878_v1 }
  0xa9   : > { %1844 = vset.pattern.permute.xlu2 %v1877_v0  ;;  %551 = vperm.xlu1 %1843, %v252_v57   ;;  %v843_v21 = vmax.f32 %v811_v16, 0.0 }
  0xaa   : > { %744 = vperm.xlu2 %1844, %v252_v57   ;;  %1859 = vset.pattern.permute.xlu0 %v1877_v0 }
  0xab   : > { %720 = vperm.xlu0 %1859, %v246_v58  }
  0xac   : > { %v665_v14 = vpop.permute.xlu1 %664 }
  0xad   : > { %1688 = vmatmul.msk.f32.gmra.mxu0 %vm880_vm0, %v842_v12  ;;  %v780_v22 = vmul.f32 %v2028_v42, %v665_v14 }
  0xae   : > { %v2056_v20 = vpop.permute.xlu0 %318 }
  0xaf   : > { %v484_v17 = vpop.permute.xlu2 %483  ;;  %v812_v25 = vadd.f32 %v780_v22, %v619_v23 }
  0xb0   : > { %v590_v50 = vmul.f32 %v2026_v41, %v484_v17 }
  0xb1   : > { %515 = vperm.xlu1 %1843, %v243_v39   ;;  %v844_v31 = vmax.f32 %v812_v25, 0.0 }
  0xb2   : > { %708 = vperm.xlu2 %1844, %v243_v39   ;;  %v244_v39 = vld [vmem:[%s1929_s24 + $0x80] sm:$0xff] }
  0xb5   : > { %v476_v24 = vpop.permute.xlu1 %475  ;;  %1689 = vmatmul.msk.f32.gmra.mxu0 %vm880_vm0, %v843_v21 }
  0xb6   : > { %v588_v26 = vmul.f32 %v2026_v41, %v476_v24 }
  0xb7   : > { %v488_v27 = vpop.permute.xlu2 %487  ;;  %v677_v34 = vpop.permute.xlu0 %676 }
  0xb8   : > { %v620_v32 = vadd.f32 %v588_v26, %v427_v28  ;;  %v783_v54 = vmul.f32 %v2028_v42, %v677_v34  ;;  %v591_v4 = vmul.f32 %v2026_v41, %v488_v27  ;;  %v1129_v28 = vld [vmem:[%s2432_s3 + $0x38] sm:$0xff] }
  0xb9   : > { %1845 = vset.pattern.permute.xlu1 %v1879_v2  ;;  %1234 = vmatpush.msra.mxu1 %v1129_v28 }
  0xba   : > { %1846 = vset.pattern.permute.xlu2 %v1878_v1  ;;  %388 = vperm.xlu1 %1845, %v1959_v13   ;;  %v813_v43 = vadd.f32 %v781_v30, %v620_v32  ;;  %v433_v30 = vmul.f32 %v2024_v40, %v2056_v20  ;;  %v1128_v32 = vld [vmem:[%s2432_s3 + $0x30] sm:$0xff] }
  0xbb   : > { %555 = vperm.xlu2 %1846, %v1959_v13   ;;  %1792 = vmatpush.msrb.mxu3 %v1129_v28 }
  0xbc   : > { %v845_v13 = vmax.f32 %v813_v43, 0.0  ;;  %1235 = vmatpush.msra.mxu1 %v1128_v32  ;;  %v1126_v43 = vld [vmem:[%s2432_s3 + $0x20] sm:$0xff] }
  0xbd   : > { %v480_v35 = vpop.permute.xlu1 %479  ;;  %1690 = vmatmul.msk.f32.gmra.mxu0 %vm880_vm0, %v844_v31  ;;  %1793 = vmatpush.msrb.mxu3 %v1128_v32 }
  0xbe   : > { %v589_v38 = vmul.f32 %v2026_v41, %v480_v35 }
  0xbf   : > { %v2077_v47 = vpop.permute.xlu0 %696 }
  0xc0   : > { %v309_v44 = vpop.permute.xlu2 %308  ;;  %v621_v45 = vadd.f32 %v589_v38, %v428_v37  ;;  %v256_v37 = vld [vmem:[%s1929_s24 + $0xe0] sm:$0xff] }
  0xc1   : > { %v431_v11 = vmul.f32 %v2024_v40, %v309_v44 }
  0xc2   : > { %343 = vperm.xlu1 %1845, %v244_v39   ;;  %v814_v52 = vadd.f32 %v782_v46, %v621_v45  ;;  %v1125_v45 = vld [vmem:[%s2432_s3 + $0x18] sm:$0xff]  ;;  %v1124_v46 = vld [vmem:[%s2432_s3 + $0x10] sm:$0xff] }
  0xc3   : > { %519 = vperm.xlu2 %1846, %v244_v39  }
  0xc4   : > { %v846_v56 = vmax.f32 %v814_v52, 0.0  ;;  %v788_v52 = vmul.f32 %v2028_v42, %v2077_v47  ;;  %v258_v47 = vld [vmem:[%s1929_s24 + $0xf0] sm:$0xff] }
  0xc5   : > { %1691 = vmatmul.msk.f32.gmra.mxu0 %vm880_vm0, %v845_v13  ;;  %768 = vperm.xlu0 %1859, %v258_v47  }
  0xc6   : > { %v299_v49 = vpop.permute.xlu1 %298 }
  0xc7   : > { %v429_v51 = vmul.f32 %v2024_v40, %v299_v49  ;;  %v2092_v59 = vpop.permute.xlu0 %748 }
  0xc8   : > { %v314_v53 = vpop.permute.xlu2 %313 }
  0xc9   : > { %v622_v55 = vadd.f32 %v590_v50, %v429_v51  ;;  %v432_v22 = vmul.f32 %v2024_v40, %v314_v53  ;;  %v1123_v51 = vld [vmem:[%s2432_s3 + $0x8] sm:$0xff] }
  0xca   : > { %1848 = vset.pattern.permute.xlu1 %v1877_v0 }
  0xcb   : > { %1849 = vset.pattern.permute.xlu2 %v1879_v2  ;;  %712 = vperm.xlu1 %1848, %v244_v39   ;;  %v815_v60 = vadd.f32 %v783_v54, %v622_v55  ;;  %v1122_v55 = vld [vmem:[%s2432_s3] sm:$0xff] }
  0xcc   : > { %393 = vperm.xlu2 %1849, %v2007_v29  }
  0xcd   : > { %1692 = vmatmul.msk.f32.gmra.mxu0 %vm880_vm0, %v846_v56  ;;  %v847_v63 = vmax.f32 %v815_v60, 0.0  ;;  %1864 = vset.pattern.permute.xlu0 %v1878_v1 }
  0xce   : > { %v304_v57 = vpop.permute.xlu1 %303 }
  0xcf   : > { %v430_v3 = vmul.f32 %v2024_v40, %v304_v57 }
  0xd0   : > { %v492_v8 = vpop.permute.xlu0 %491 }
  0xd1   : > { %v689_v62 = vpop.permute.xlu2 %688  ;;  %v623_v6 = vadd.f32 %v591_v4, %v430_v3  ;;  %v592_v12 = vmul.f32 %v2026_v41, %v492_v8 }
  0xd2   : > { %v786_v23 = vmul.f32 %v2028_v42, %v689_v62 }
  0xd3   : > { %752 = vperm.xlu1 %1848, %v2007_v29   ;;  %v624_v15 = vadd.f32 %v592_v12, %v431_v11 }
  0xd4   : > { %348 = vperm.xlu2 %1849, %v245_v61  }
  0xd5   : > { %1693 = vmatmul.msk.f32.gmra.mxu0 %vm880_vm0, %v847_v63  ;;  %v257_v63 = vld [vmem:[%s1929_s24 + $0xe8] sm:$0xff] }
  0xd7   : > { %v681_v5 = vpop.permute.xlu1 %680 }
  0xd8   : > { %v784_v7 = vmul.f32 %v2028_v42, %v681_v5 }
  0xd9   : > { %v693_v9 = vpop.permute.xlu2 %692 }
  0xda   : > { %v816_v10 = vadd.f32 %v784_v7, %v623_v6  ;;  %v787_v20 = vmul.f32 %v2028_v42, %v693_v9 }
  0xdb   : > { %1850 = vset.pattern.permute.xlu1 %v1878_v1 }
  0xdc   : > { %v848_v29 = vmax.f32 %v816_v10, 0.0  ;;  %1851 = vset.pattern.permute.xlu2 %v1877_v0  ;;  %523 = vperm.xlu1 %1850, %v245_v61  }
  0xdd   : > { %716 = vperm.xlu2 %1851, %v245_v61   ;;  %v512_v61 = vpop.permute.xlu0 %511 }
  0xde   : > { %1694 = vmatmul.msk.f32.gmra.mxu0 %vm880_vm0, %v848_v29  ;;  %v597_v29 = vmul.f32 %v2026_v41, %v512_v61  ;;  %v250_v61 = vld [vmem:[%s1929_s24 + $0xb0] sm:$0xff] }
  0xdf   : > { %v685_v14 = vpop.permute.xlu1 %684 }
  0xe0   : > { %v785_v16 = vmul.f32 %v2028_v42, %v685_v14  ;;  %v2171_v14 = vld [vmem:[%s1929_s24 + $0xf8] sm:$0xff] }
  0xe1   : > { %579 = vperm.xlu0 %1864, %v2171_v14  }
  0xe2   : > { %v817_v17 = vadd.f32 %v785_v16, %v624_v15  ;;  %v504_v18 = vpop.permute.xlu2 %503 }
  0xe3   : > { %v595_v49 = vmul.f32 %v2026_v41, %v504_v18 }
  0xe4   : > { %v849_v19 = vmax.f32 %v817_v17, 0.0  ;;  %563 = vperm.xlu1 %1850, %v2069_v36  }
  0xe5   : > { %756 = vperm.xlu2 %1851, %v2069_v36   ;;  %v1127_v36 = vld [vmem:[%s2432_s3 + $0x28] sm:$0xff]  ;;  %v2163_v8 = vpop.permute.xlu0 %559 }
  0xe6   : > { %1695 = vmatmul.msk.f32.gmra.mxu0 %vm880_vm0, %v849_v19  ;;  %1236 = vmatpush.msra.mxu1 %v1127_v36 }
  0xe7   : > { %1794 = vmatpush.msrb.mxu3 %v1127_v36 }
  0xe8   : > { %v496_v21 = vpop.permute.xlu1 %495  ;;  %1237 = vmatpush.msra.mxu1 %v1126_v43 }
  0xe9   : > { %v593_v24 = vmul.f32 %v2026_v41, %v496_v21  ;;  %1795 = vmatpush.msrb.mxu3 %v1126_v43  ;;  %1867 = vset.pattern.permute.xlu0 %v1879_v2 }
  0xea   : > { %v2112_v25 = vpop.permute.xlu2 %507  ;;  %1238 = vmatpush.msra.mxu1 %v1125_v45 }
  0xeb   : > { %v625_v26 = vadd.f32 %v593_v24, %v432_v22  ;;  %1796 = vmatpush.msrb.mxu3 %v1125_v45  ;;  %v596_v4 = vmul.f32 %v2026_v41, %v2112_v25 }
  0xec   : > { %1852 = vset.pattern.permute.xlu1 %v1879_v2  ;;  %1239 = vmatpush.msra.mxu1 %v1124_v46 }
  0xed   : > { %1853 = vset.pattern.permute.xlu2 %v1878_v1  ;;  %353 = vperm.xlu1 %1852, %v246_v58   ;;  %v818_v27 = vadd.f32 %v786_v23, %v625_v26  ;;  %v2175_v19 = vpop.permute.xlu0 %531 }
  0xee   : > { %527 = vperm.xlu2 %1853, %v246_v58   ;;  %1797 = vmatpush.msrb.mxu3 %v1124_v46 }
  0xef   : > { %v850_v31 = vmax.f32 %v818_v27, 0.0  ;;  %1240 = vmatpush.msra.mxu1 %v1123_v51 }
  0xf0   : > { %v500_v34 = vpop.permute.xlu1 %499  ;;  %1798 = vmatpush.msrb.mxu3 %v1123_v51 }
  0xf1   : > { %v594_v35 = vmul.f32 %v2026_v41, %v500_v34  ;;  %1696 = vmatmul.msk.f32.gmra.mxu0 %vm880_vm0, %v850_v31  ;;  %1241 = vmatpush.msra.mxu1 %v1122_v55 }
  0xf2   : > { %1799 = vmatpush.msrb.mxu3 %v1122_v55 }
  0xf3   : > { %v626_v38 = vadd.f32 %v594_v35, %v433_v30  ;;  %v334_v39 = vpop.permute.xlu2 %333 }
  0xf5   : > { %403 = vperm.xlu1 %1852, %v256_v37   ;;  %v819_v44 = vadd.f32 %v787_v20, %v626_v38  ;;  %v249_v38 = vld [vmem:[%s1929_s24 + $0xa8] sm:$0xff] }
  0xf6   : > { %567 = vperm.xlu2 %1853, %v256_v37  }
  0xf7   : > { %v851_v13 = vmax.f32 %v819_v44, 0.0 }
  0xf9   : > { %v324_v50 = vpop.permute.xlu1 %323  ;;  %1697 = vmatmul.msk.f32.gmra.mxu0 %vm880_vm0, %v851_v13  ;;  %v251_v13 = vld [vmem:[%s1929_s24 + $0xb8] sm:$0xff] }
  0xfa   : > { %v434_v53 = vmul.f32 %v2024_v40, %v324_v50  ;;  %378 = vperm.xlu0 %1867, %v251_v13  }
  0xfb   : > { %v384_v54 = vpop.permute.xlu2 %383 }
  0xfc   : > { %v627_v56 = vadd.f32 %v595_v49, %v434_v53  ;;  %v446_v25 = vmul.f32 %v2024_v40, %v384_v54  ;;  %v801_v53 = vmul.f32 %v2028_v42, %v2092_v59 }
  0xfd   : > { %1854 = vset.pattern.permute.xlu1 %v1877_v0 }
  0xfe   : > { %1855 = vset.pattern.permute.xlu2 %v1879_v2  ;;  %760 = vperm.xlu1 %1854, %v256_v37   ;;  %v820_v57 = vadd.f32 %v788_v52, %v627_v56 }
  0xff   : > { %358 = vperm.xlu2 %1855, %v2014_v33  }
 0x100   : > { %v852_v58 = vmax.f32 %v820_v57, 0.0 }
 0x101   : > { %v329_v60 = vpop.permute.xlu1 %328 }
 0x102   : > { %1698 = vmatmul.msk.f32.gmra.mxu0 %vm880_vm0, %v852_v58  ;;  %v435_v3 = vmul.f32 %v2024_v40, %v329_v60  ;;  %1868 = vset.pattern.permute.xlu0 %v1877_v0 }
 0x104   : > { %v745_v62 = vpop.permute.xlu2 %744  ;;  %v628_v6 = vadd.f32 %v596_v4, %v435_v3 }
 0x105   : > { %v800_v26 = vmul.f32 %v2028_v42, %v745_v62 }
 0x106   : > { %724 = vperm.xlu1 %1854, %v2014_v33   ;;  %v436_v33 = vmul.f32 %v2024_v40, %v334_v39 }
 0x107   : > { %408 = vperm.xlu2 %1855, %v257_v63  }
 0x108   : > { %v629_v15 = vadd.f32 %v597_v29, %v436_v33 }
 0x10a   : > { %v701_v5 = vpop.permute.xlu1 %700 }
 0x10b   : > { %v789_v7 = vmul.f32 %v2028_v42, %v701_v5 }
 0x10c   : > { %v709_v9 = vpop.permute.xlu2 %708 }
 0x10d   : > { %v821_v10 = vadd.f32 %v789_v7, %v628_v6  ;;  %v791_v39 = vmul.f32 %v2028_v42, %v709_v9 }
 0x10e   : > { %1857 = vset.pattern.permute.xlu1 %v1878_v1 }
 0x10f   : > { %v853_v11 = vmax.f32 %v821_v10, 0.0  ;;  %571 = vperm.xlu1 %1857, %v257_v63   ;;  %1858 = vset.pattern.permute.xlu2 %v1877_v0  ;;  %v609_v10 = vmul.f32 %v2026_v41, %v2163_v8 }
 0x110   : > { %764 = vperm.xlu2 %1858, %v257_v63  }
 0x111   : > { %1699 = vmatmul.msk.f32.gmra.mxu0 %vm880_vm0, %v853_v11 }
 0x112   : > { %v705_v12 = vpop.permute.xlu1 %704 }
 0x113   : > { %v790_v16 = vmul.f32 %v2028_v42, %v705_v12 }
 0x115   : > { %v822_v17 = vadd.f32 %v790_v16, %v629_v15  ;;  %v556_v18 = vpop.permute.xlu2 %555 }
 0x116   : > { %v608_v50 = vmul.f32 %v2026_v41, %v556_v18 }
 0x117   : > { %v854_v21 = vmax.f32 %v822_v17, 0.0  ;;  %535 = vperm.xlu1 %1857, %v2080_v48  }
 0x118   : > { %728 = vperm.xlu2 %1858, %v2080_v48   ;;  %v339_v48 = vpop.permute.xlu0 %338 }
 0x119   : > { %1700 = vmatmul.msk.f32.gmra.mxu0 %vm880_vm0, %v854_v21  ;;  %v437_v34 = vmul.f32 %v2024_v40, %v339_v48 }
 0x11a   : > { %v994_v22 = vpop.f32.mrf.mxu0 }
 0x11b   : > { %v1090_v23 = vmax.f32 %v994_v22, 0.0  ;;  %v552_v24 = vpop.permute.xlu1 %551 }
 0x11c   : > { %v607_v27 = vmul.f32 %v2026_v41, %v552_v24 }
 0x11d   : > { %1718 = vmatmul.msk.f32.vlgmr.msra.gmra.mxu1 %vm880_vm0, %v1090_v23  ;;  %v520_v30 = vpop.permute.xlu2 %519 }
 0x11e   : > { %v639_v28 = vadd.f32 %v607_v27, %v446_v25  ;;  %v599_v3 = vmul.f32 %v2026_v41, %v520_v30 }
 0x11f   : > { %1860 = vset.pattern.permute.xlu1 %v1879_v2 }
 0x120   : > { %413 = vperm.xlu1 %1860, %v258_v47   ;;  %v832_v31 = vadd.f32 %v800_v26, %v639_v28  ;;  %1861 = vset.pattern.permute.xlu2 %v1878_v1  ;;  %v399_v8 = vpop.permute.xlu0 %398 }
 0x121   : > { %575 = vperm.xlu2 %1861, %v258_v47  }
 0x122   : > { %v997_v32 = vpop.f32.mrf.mxu0  ;;  %v864_v35 = vmax.f32 %v832_v31, 0.0 }
 0x123   : > { %v1091_v36 = vmax.f32 %v997_v32, 0.0  ;;  %v516_v37 = vpop.permute.xlu1 %515  ;;  %v449_v32 = vmul.f32 %v2024_v40, %v399_v8 }
 0x124   : > { %v598_v20 = vmul.f32 %v2026_v41, %v516_v37  ;;  %1710 = vmatmul.msk.f32.vlgmr.msra.gmra.mxu3 %vm880_vm0, %v864_v35 }
 0x125   : > { %1719 = vmatmul.msk.f32.gmra.mxu1 %vm880_vm0, %v1091_v36 }
 0x126   : > { %v630_v43 = vadd.f32 %v598_v20, %v437_v34  ;;  %v394_v44 = vpop.permute.xlu2 %393 }
 0x127   : > { %v448_v33 = vmul.f32 %v2024_v40, %v394_v44 }
 0x128   : > { %368 = vperm.xlu1 %1860, %v249_v38   ;;  %v823_v45 = vadd.f32 %v791_v39, %v630_v43  ;;  %v2225_v31 = vpop.permute.xlu0 %363 }
 0x129   : > { %539 = vperm.xlu2 %1861, %v249_v38   ;;  %v641_v15 = vadd.f32 %v609_v10, %v448_v33 }
 0x12a   : > { %v1000_v46 = vpop.f32.mrf.mxu0  ;;  %v855_v49 = vmax.f32 %v823_v45, 0.0 }
 0x12b   : > { %v1092_v51 = vmax.f32 %v1000_v46, 0.0 }
 0x12c   : > { %v389_v52 = vpop.permute.xlu1 %388  ;;  %1701 = vmatmul.msk.f32.gmra.mxu0 %vm880_vm0, %v855_v49 }
 0x12d   : > { %v447_v54 = vmul.f32 %v2024_v40, %v389_v52  ;;  %1720 = vmatmul.msk.f32.gmra.mxu1 %vm880_vm0, %v1092_v51 }
 0x12e   : > { %v349_v57 = vpop.permute.xlu2 %348 }
 0x12f   : > { %v640_v55 = vadd.f32 %v608_v50, %v447_v54  ;;  %v439_v23 = vmul.f32 %v2024_v40, %v349_v57 }
 0x130   : > { %1862 = vset.pattern.permute.xlu1 %v1877_v0 }
 0x131   : > { %732 = vperm.xlu1 %1862, %v249_v38   ;;  %v833_v56 = vadd.f32 %v801_v53, %v640_v55  ;;  %1863 = vset.pattern.permute.xlu2 %v1879_v2 }
 0x132   : > { %v1003_v47 = vpop.f32.mrf.mxu0  ;;  %418 = vperm.xlu2 %1863, %v2171_v14  }
 0x133   : > { %v1093_v58 = vmax.f32 %v1003_v47, 0.0  ;;  %v865_v59 = vmax.f32 %v833_v56, 0.0 }
 0x134   : > { %v344_v60 = vpop.permute.xlu1 %343 }
 0x135   : > { %1711 = vmatmul.msk.f32.gmra.mxu3 %vm880_vm0, %v865_v59  ;;  %1721 = vmatmul.msk.f32.gmra.mxu1 %vm880_vm0, %v1093_v58  ;;  %v438_v62 = vmul.f32 %v2024_v40, %v344_v60  ;;  %v1378_v60 = vld [vmem:[%s2433_s4 + $0x38] sm:$0xff] }
 0x136   : > { %1483 = vmatpush.msra.mxu2 %v1378_v60  ;;  %1800 = vmatpush.msra.mxu3 %v1378_v60 }
 0x137   : > { %v717_v4 = vpop.permute.xlu2 %716  ;;  %v631_v6 = vadd.f32 %v599_v3, %v438_v62 }
 0x138   : > { %v793_v24 = vmul.f32 %v2028_v42, %v717_v4 }
 0x139   : > { %772 = vperm.xlu1 %1862, %v2171_v14  }
 0x13a   : > { %v1006_v63 = vpop.f32.mrf.mxu0  ;;  %373 = vperm.xlu2 %1863, %v250_v61  }
 0x13b   : > { %v1094_v2 = vmax.f32 %v1006_v63, 0.0 }
 0x13d   : > { %v713_v5 = vpop.permute.xlu1 %712  ;;  %1722 = vmatmul.msk.f32.gmra.mxu1 %vm880_vm0, %v1094_v2  ;;  %v1377_v2 = vld [vmem:[%s2433_s4 + $0x30] sm:$0xff] }
 0x13e   : > { %v792_v7 = vmul.f32 %v2028_v42, %v713_v5  ;;  %1484 = vmatpush.msra.mxu2 %v1377_v2  ;;  %1801 = vmatpush.msra.mxu3 %v1377_v2 }
 0x13f   : > { %v757_v16 = vpop.permute.xlu2 %756 }
 0x140   : > { %v824_v9 = vadd.f32 %v792_v7, %v631_v6  ;;  %v803_v37 = vmul.f32 %v2028_v42, %v757_v16  ;;  %v1376_v6 = vld [vmem:[%s2433_s4 + $0x28] sm:$0xff]  ;;  %v1373_v16 = vld [vmem:[%s2433_s4 + $0x10] sm:$0xff] }
 0x141   : > { %1865 = vset.pattern.permute.xlu1 %v1878_v1  ;;  %1485 = vmatpush.msra.mxu2 %v1376_v6 }
 0x142   : > { %v856_v11 = vmax.f32 %v824_v9, 0.0  ;;  %543 = vperm.xlu1 %1865, %v250_v61   ;;  %v1009_v29 = vpop.f32.mrf.mxu0  ;;  %1866 = vset.pattern.permute.xlu2 %v1877_v0  ;;  %v1375_v9 = vld [vmem:[%s2433_s4 + $0x20] sm:$0xff] }
 0x143   : > { %v1095_v12 = vmax.f32 %v1009_v29, 0.0  ;;  %736 = vperm.xlu2 %1866, %v250_v61   ;;  %1802 = vmatpush.msra.mxu3 %v1376_v6 }
 0x144   : > { %1702 = vmatmul.msk.f32.gmra.mxu0 %vm880_vm0, %v856_v11  ;;  %1486 = vmatpush.msra.mxu2 %v1375_v9  ;;  %v1374_v11 = vld [vmem:[%s2433_s4 + $0x18] sm:$0xff] }
 0x145   : > { %v753_v14 = vpop.permute.xlu1 %752  ;;  %1723 = vmatmul.msk.f32.gmra.mxu1 %vm880_vm0, %v1095_v12  ;;  %1803 = vmatpush.msra.mxu3 %v1375_v9 }
 0x146   : > { %v802_v1 = vmul.f32 %v2028_v42, %v753_v14  ;;  %1487 = vmatpush.msra.mxu2 %v1374_v11  ;;  %v602_v14 = vmul.f32 %v2026_v41, %v2175_v19 }
 0x147   : > { %1804 = vmatpush.msra.mxu3 %v1374_v11 }
 0x148   : > { %v834_v17 = vadd.f32 %v802_v1, %v641_v15  ;;  %v528_v26 = vpop.permute.xlu2 %527  ;;  %1488 = vmatpush.msra.mxu2 %v1373_v16 }
 0x149   : > { %v601_v46 = vmul.f32 %v2026_v41, %v528_v26  ;;  %1805 = vmatpush.msra.mxu3 %v1373_v16 }
 0x14a   : > { %v866_v18 = vmax.f32 %v834_v17, 0.0  ;;  %547 = vperm.xlu1 %1865, %v251_v13   ;;  %v1012_v21 = vpop.f32.mrf.mxu0 }
 0x14b   : > { %v1096_v22 = vmax.f32 %v1012_v21, 0.0  ;;  %740 = vperm.xlu2 %1866, %v251_v13   ;;  %v721_v13 = vpop.permute.xlu0 %720  ;;  %v1371_v21 = vld [vmem:[%s2433_s4] sm:$0xff] }
 0x14c   : > { %1712 = vmatmul.msk.f32.gmra.mxu3 %vm880_vm0, %v866_v18  ;;  %v794_v51 = vmul.f32 %v2028_v42, %v721_v13  ;;  %v1372_v18 = vld [vmem:[%s2433_s4 + $0x8] sm:$0xff] }
 0x14d   : > { %1724 = vmatmul.msk.f32.gmra.mxu1 %vm880_vm0, %v1096_v22  ;;  %1489 = vmatpush.msra.mxu2 %v1372_v18 }
 0x14e   : > { %v524_v0 = vpop.permute.xlu1 %523  ;;  %1806 = vmatpush.msra.mxu3 %v1372_v18 }
 0x14f   : > { %v600_v25 = vmul.f32 %v2026_v41, %v524_v0  ;;  %1490 = vmatpush.msra.mxu2 %v1371_v21 }
 0x150   : > { %v568_v38 = vpop.permute.xlu2 %567  ;;  %1807 = vmatpush.msra.mxu3 %v1371_v21 }
 0x151   : > { %v632_v27 = vadd.f32 %v600_v25, %v439_v23  ;;  %v611_v62 = vmul.f32 %v2026_v41, %v568_v38 }
 0x152   : > { %v1015_v28 = vpop.f32.mrf.mxu0 }
 0x153   : > { %v1097_v30 = vmax.f32 %v1015_v28, 0.0  ;;  %v825_v48 = vadd.f32 %v793_v24, %v632_v27  ;;  %v769_v13 = vpop.permute.xlu0 %768 }
 0x155   : > { %1725 = vmatmul.msk.f32.gmra.mxu1 %vm880_vm0, %v1097_v30  ;;  %v857_v34 = vmax.f32 %v825_v48, 0.0 }
 0x156   : > { %v564_v35 = vpop.permute.xlu1 %563 }
 0x157   : > { %v610_v36 = vmul.f32 %v2026_v41, %v564_v35  ;;  %1703 = vmatmul.msk.f32.gmra.mxu0 %vm880_vm0, %v857_v34  ;;  %v442_v35 = vmul.f32 %v2024_v40, %v2225_v31 }
 0x159   : > { %v642_v20 = vadd.f32 %v610_v36, %v449_v32  ;;  %v359_v54 = vpop.permute.xlu2 %358 }
 0x15a   : > { %v441_v10 = vmul.f32 %v2024_v40, %v359_v54 }
 0x15b   : > { %v1018_v39 = vpop.f32.mrf.mxu0  ;;  %v835_v43 = vadd.f32 %v803_v37, %v642_v20 }
 0x15c   : > { %v1098_v44 = vmax.f32 %v1018_v39, 0.0  ;;  %v634_v17 = vadd.f32 %v602_v14, %v441_v10 }
 0x15d   : > { %v867_v45 = vmax.f32 %v835_v43, 0.0 }
 0x15e   : > { %1726 = vmatmul.msk.f32.gmra.mxu1 %vm880_vm0, %v1098_v44 }
 0x15f   : > { %v354_v49 = vpop.permute.xlu1 %353  ;;  %1713 = vmatmul.msk.f32.gmra.mxu3 %vm880_vm0, %v867_v45 }
 0x160   : > { %v440_v50 = vmul.f32 %v2024_v40, %v354_v49 }
 0x161   : > { %v409_v58 = vpop.permute.xlu2 %408 }
 0x162   : > { %v633_v52 = vadd.f32 %v601_v46, %v440_v50  ;;  %v451_v26 = vmul.f32 %v2024_v40, %v409_v58  ;;  %v806_v50 = vmul.f32 %v2028_v42, %v769_v13 }
 0x163   : > { %v1021_v53 = vpop.f32.mrf.mxu0 }
 0x164   : > { %v826_v55 = vadd.f32 %v794_v51, %v633_v52  ;;  %v1099_v56 = vmax.f32 %v1021_v53, 0.0 }
 0x166   : > { %v858_v57 = vmax.f32 %v826_v55, 0.0  ;;  %1727 = vmatmul.msk.f32.gmra.mxu1 %vm880_vm0, %v1099_v56 }
 0x167   : > { %v404_v47 = vpop.permute.xlu1 %403 }
 0x168   : > { %1704 = vmatmul.msk.f32.gmra.mxu0 %vm880_vm0, %v858_v57  ;;  %v450_v59 = vmul.f32 %v2024_v40, %v404_v47 }
 0x16a   : > { %v643_v4 = vadd.f32 %v611_v62, %v450_v59  ;;  %v765_v12 = vpop.permute.xlu2 %764 }
 0x16b   : > { %v805_v27 = vmul.f32 %v2028_v42, %v765_v12 }
 0x16e   : > { %v1024_v61 = vpop.f32.mrf.mxu0 }
 0x16f   : > { %v1100_v63 = vmax.f32 %v1024_v61, 0.0 }
 0x170   : > { %v761_v3 = vpop.permute.xlu1 %760 }
 0x171   : > { %v804_v5 = vmul.f32 %v2028_v42, %v761_v3  ;;  %1728 = vmatmul.msk.f32.gmra.mxu1 %vm880_vm0, %v1100_v63 }
 0x172   : > { %v729_v24 = vpop.permute.xlu2 %728 }
 0x173   : > { %v836_v7 = vadd.f32 %v804_v5, %v643_v4  ;;  %v796_v20 = vmul.f32 %v2028_v42, %v729_v24  ;;  %v580_v5 = vpop.permute.xlu0 %579 }
 0x175   : > { %v868_v33 = vmax.f32 %v836_v7, 0.0 }
 0x176   : > { %v1027_v29 = vpop.f32.mrf.mxu0 }
 0x177   : > { %v1101_v15 = vmax.f32 %v1027_v29, 0.0  ;;  %1714 = vmatmul.msk.f32.gmra.mxu3 %vm880_vm0, %v868_v33  ;;  %v614_v33 = vmul.f32 %v2026_v41, %v580_v5 }
 0x178   : > { %v725_v1 = vpop.permute.xlu1 %724 }
 0x179   : > { %v795_v8 = vmul.f32 %v2028_v42, %v725_v1  ;;  %1729 = vmatmul.msk.f32.gmra.mxu1 %vm880_vm0, %v1101_v15 }
 0x17b   : > { %v827_v19 = vadd.f32 %v795_v8, %v634_v17  ;;  %v576_v37 = vpop.permute.xlu2 %575 }
 0x17c   : > { %v613_v46 = vmul.f32 %v2026_v41, %v576_v37 }
 0x17d   : > { %v859_v22 = vmax.f32 %v827_v19, 0.0 }
 0x17f   : > { %v1030_v0 = vpop.f32.mrf.mxu0  ;;  %1705 = vmatmul.msk.f32.gmra.mxu0 %vm880_vm0, %v859_v22 }
 0x180   : > { %v1102_v23 = vmax.f32 %v1030_v0, 0.0 }
 0x181   : > { %v572_v25 = vpop.permute.xlu1 %571 }
 0x182   : > { %v612_v28 = vmul.f32 %v2026_v41, %v572_v25  ;;  %1730 = vmatmul.msk.f32.gmra.mxu1 %vm880_vm0, %v1102_v23 }
 0x183   : > { %v540_v51 = vpop.permute.xlu2 %539 }
 0x184   : > { %v644_v30 = vadd.f32 %v612_v28, %v451_v26  ;;  %v604_v61 = vmul.f32 %v2026_v41, %v540_v51  ;;  %v379_v28 = vpop.permute.xlu0 %378 }
 0x186   : > { %v837_v48 = vadd.f32 %v805_v27, %v644_v30 }
 0x188   : > { %v869_v32 = vmax.f32 %v837_v48, 0.0 }
 0x189   : > { %v536_v34 = vpop.permute.xlu1 %535 }
 0x18a   : > { %v603_v36 = vmul.f32 %v2026_v41, %v536_v34  ;;  %1715 = vmatmul.msk.f32.gmra.mxu3 %vm880_vm0, %v869_v32  ;;  %v445_v34 = vmul.f32 %v2024_v40, %v379_v28 }
 0x18c   : > { %v635_v38 = vadd.f32 %v603_v36, %v442_v35  ;;  %v419_v59 = vpop.permute.xlu2 %418 }
 0x18d   : > { %v453_v7 = vmul.f32 %v2024_v40, %v419_v59 }
 0x18e   : > { %v1033_v39 = vpop.f32.mrf.mxu0  ;;  %v828_v43 = vadd.f32 %v796_v20, %v635_v38 }
 0x18f   : > { %v1103_v44 = vmax.f32 %v1033_v39, 0.0  ;;  %v646_v16 = vadd.f32 %v614_v33, %v453_v7 }
 0x190   : > { %v860_v45 = vmax.f32 %v828_v43, 0.0 }
 0x191   : > { %1731 = vmatmul.msk.f32.gmra.mxu1 %vm880_vm0, %v1103_v44 }
 0x192   : > { %v414_v49 = vpop.permute.xlu1 %413  ;;  %1706 = vmatmul.msk.f32.gmra.mxu0 %vm880_vm0, %v860_v45 }
 0x193   : > { %v452_v31 = vmul.f32 %v2024_v40, %v414_v49 }
 0x194   : > { %v374_v10 = vpop.permute.xlu2 %373 }
 0x195   : > { %v645_v52 = vadd.f32 %v613_v46, %v452_v31  ;;  %v444_v0 = vmul.f32 %v2024_v40, %v374_v10 }
 0x196   : > { %v1036_v53 = vpop.f32.mrf.mxu0 }
 0x197   : > { %v838_v54 = vadd.f32 %v806_v50, %v645_v52  ;;  %v1104_v55 = vmax.f32 %v1036_v53, 0.0 }
 0x199   : > { %v870_v56 = vmax.f32 %v838_v54, 0.0  ;;  %1732 = vmatmul.msk.f32.gmra.mxu1 %vm880_vm0, %v1104_v55 }
 0x19a   : > { %v369_v57 = vpop.permute.xlu1 %368  ;;  %v1243_v47 = vpop.f32.mrf.mxu1 }
 0x19b   : > { %v1339_v58 = vmax.f32 %v1243_v47, 0.0  ;;  %1716 = vmatmul.msk.f32.gmra.mxu3 %vm880_vm0, %v870_v56  ;;  %v443_v60 = vmul.f32 %v2024_v40, %v369_v57 }
 0x19d   : > { %1750 = vmatmul.msk.f32.vlgmr.msra.gmra.mxu2 %vm880_vm0, %v1339_v58  ;;  %v636_v3 = vadd.f32 %v604_v61, %v443_v60  ;;  %v737_v18 = vpop.permute.xlu2 %736 }
 0x19e   : > { %v798_v24 = vmul.f32 %v2028_v42, %v737_v18 }
 0x1a2   : > { %v1246_v62 = vpop.f32.mrf.mxu1 }
 0x1a3   : > { %v1340_v63 = vmax.f32 %v1246_v62, 0.0  ;;  %v733_v2 = vpop.permute.xlu1 %732 }
 0x1a4   : > { %v797_v4 = vmul.f32 %v2028_v42, %v733_v2 }
 0x1a5   : > { %1751 = vmatmul.msk.f32.gmra.mxu2 %vm880_vm0, %v1340_v63  ;;  %v741_v36 = vpop.permute.xlu2 %740 }
 0x1a6   : > { %v829_v6 = vadd.f32 %v797_v4, %v636_v3  ;;  %v799_v39 = vmul.f32 %v2028_v42, %v741_v36 }
 0x1a7   : > { %v1066_v23 = vpop.f32.mrf.mxu3 }
 0x1a8   : > { %v861_v9 = vmax.f32 %v829_v6, 0.0  ;;  %v1114_v27 = vmax.f32 %v1066_v23, 0.0 }
 0x1a9   : > { %v1039_v11 = vpop.f32.mrf.mxu0 }
 0x1aa   : > { %v1105_v29 = vmax.f32 %v1039_v11, 0.0  ;;  %1707 = vmatmul.msk.f32.gmra.mxu0 %vm880_vm0, %v861_v9  ;;  %v1249_v12 = vpop.f32.mrf.mxu1 }
 0x1ab   : > { %v1341_v14 = vmax.f32 %v1249_v12, 0.0  ;;  %v773_v15 = vpop.permute.xlu1 %772 }
 0x1ac   : > { %v807_v1 = vmul.f32 %v2028_v42, %v773_v15  ;;  %1733 = vmatmul.msk.f32.gmra.mxu1 %vm880_vm0, %v1105_v29 }
 0x1ad   : > { %1752 = vmatmul.msk.f32.gmra.mxu2 %vm880_vm0, %v1341_v14 }
 0x1ae   : > { %v839_v17 = vadd.f32 %v807_v1, %v646_v16 }
 0x1b0   : > { %v871_v8 = vmax.f32 %v839_v17, 0.0 }
 0x1b2   : > { %1717 = vmatmul.msk.f32.gmra.mxu3 %vm880_vm0, %v871_v8  ;;  %v1252_v19 = vpop.f32.mrf.mxu1 }
 0x1b3   : > { %v1342_v21 = vmax.f32 %v1252_v19, 0.0 }
 0x1b4   : > { %v544_v22 = vpop.permute.xlu1 %543 }
 0x1b5   : > { %v605_v25 = vmul.f32 %v2026_v41, %v544_v22  ;;  %1753 = vmatmul.msk.f32.gmra.mxu2 %vm880_vm0, %v1342_v21 }
 0x1b7   : > { %v637_v26 = vadd.f32 %v605_v25, %v444_v0 }
 0x1b8   : > { %v1069_v20 = vpop.f32.mrf.mxu3 }
 0x1b9   : > { %v830_v30 = vadd.f32 %v798_v24, %v637_v26  ;;  %v1115_v44 = vmax.f32 %v1069_v20, 0.0 }
 0x1ba   : > { %v1255_v48 = vpop.f32.mrf.mxu1  ;;  %1742 = vmatmul.msk.f32.vlgmr.msrb.gmra.mxu3 %vm880_vm0, %v1114_v27 }
 0x1bb   : > { %v1343_v32 = vmax.f32 %v1255_v48, 0.0  ;;  %v862_v35 = vmax.f32 %v830_v30, 0.0 }
 0x1bc   : > { %v548_v37 = vpop.permute.xlu1 %547 }
 0x1bd   : > { %v606_v38 = vmul.f32 %v2026_v41, %v548_v37  ;;  %1708 = vmatmul.msk.f32.gmra.mxu0 %vm880_vm0, %v862_v35  ;;  %1754 = vmatmul.msk.f32.gmra.mxu2 %vm880_vm0, %v1343_v32 }
 0x1bf   : > { %v638_v43 = vadd.f32 %v606_v38, %v445_v34 }
 0x1c1   : > { %v1042_v45 = vpop.f32.mrf.mxu0  ;;  %v831_v13 = vadd.f32 %v799_v39, %v638_v43 }
 0x1c2   : > { %v1106_v46 = vmax.f32 %v1042_v45, 0.0  ;;  %v1258_v49 = vpop.f32.mrf.mxu1  ;;  %1743 = vmatmul.msk.f32.gmra.mxu3 %vm880_vm0, %v1115_v44 }
 0x1c3   : > { %v1344_v40 = vmax.f32 %v1258_v49, 0.0  ;;  %v863_v31 = vmax.f32 %v831_v13, 0.0 }
 0x1c4   : > { %1734 = vmatmul.msk.f32.gmra.mxu1 %vm880_vm0, %v1106_v46 }
 0x1c5   : > { %1709 = vmatmul.msk.f32.gmra.mxu0 %vm880_vm0, %v863_v31  ;;  %1755 = vmatmul.msk.f32.gmra.mxu2 %vm880_vm0, %v1344_v40 }
 0x1ca   : > { %v1261_v41 = vpop.f32.mrf.mxu1 }
 0x1cb   : > { %v1345_v50 = vmax.f32 %v1261_v41, 0.0 }
 0x1cd   : > { %1756 = vmatmul.msk.f32.gmra.mxu2 %vm880_vm0, %v1345_v50 }
 0x1cf   : > { %v1072_v42 = vpop.f32.mrf.mxu3 }
 0x1d0   : > { %v1116_v51 = vmax.f32 %v1072_v42, 0.0 }
 0x1d2   : > { %v1264_v52 = vpop.f32.mrf.mxu1  ;;  %1744 = vmatmul.msk.f32.gmra.mxu3 %vm880_vm0, %v1116_v51 }
 0x1d3   : > { %v1346_v53 = vmax.f32 %v1264_v52, 0.0 }
 0x1d4   : > { %v1045_v54 = vpop.f32.mrf.mxu0 }
 0x1d5   : > { %v1107_v55 = vmax.f32 %v1045_v54, 0.0  ;;  %1757 = vmatmul.msk.f32.gmra.mxu2 %vm880_vm0, %v1346_v53 }
 0x1d7   : > { %1735 = vmatmul.msk.f32.gmra.mxu1 %vm880_vm0, %v1107_v55 }
 0x1db   : > { %v1267_v56 = vpop.f32.mrf.mxu1 }
 0x1dc   : > { %v1347_v57 = vmax.f32 %v1267_v56, 0.0 }
 0x1de   : > { %1758 = vmatmul.msk.f32.gmra.mxu2 %vm880_vm0, %v1347_v57 }
 0x1e2   : > { %v1075_v47 = vpop.f32.mrf.mxu3 }
 0x1e3   : > { %v1117_v58 = vmax.f32 %v1075_v47, 0.0  ;;  %v1270_v59 = vpop.f32.mrf.mxu1 }
 0x1e4   : > { %v1348_v60 = vmax.f32 %v1270_v59, 0.0 }
 0x1e5   : > { %v1048_v61 = vpop.f32.mrf.mxu0  ;;  %1745 = vmatmul.msk.f32.gmra.mxu3 %vm880_vm0, %v1117_v58 }
 0x1e6   : > { %v1108_v62 = vmax.f32 %v1048_v61, 0.0  ;;  %1759 = vmatmul.msk.f32.gmra.mxu2 %vm880_vm0, %v1348_v60 }
 0x1e8   : > { %1736 = vmatmul.msk.f32.gmra.mxu1 %vm880_vm0, %v1108_v62 }
 0x1ee   : > { %v1273_v63 = vpop.f32.mrf.mxu1 }
 0x1ef   : > { %v1349_v2 = vmax.f32 %v1273_v63, 0.0 }
 0x1f1   : > { %1760 = vmatmul.msk.f32.gmra.mxu2 %vm880_vm0, %v1349_v2 }
 0x1f6   : > { %v1276_v3 = vpop.f32.mrf.mxu1 }
 0x1f7   : > { %v1350_v4 = vmax.f32 %v1276_v3, 0.0 }
 0x1f9   : > { %1761 = vmatmul.msk.f32.gmra.mxu2 %vm880_vm0, %v1350_v4 }
 0x1fa   : > { %v1078_v5 = vpop.f32.mrf.mxu3 }
 0x1fb   : > { %v1118_v6 = vmax.f32 %v1078_v5, 0.0 }
 0x1fc   : > { %v1051_v7 = vpop.f32.mrf.mxu0 }
 0x1fd   : > { %v1109_v9 = vmax.f32 %v1051_v7, 0.0  ;;  %1746 = vmatmul.msk.f32.gmra.mxu3 %vm880_vm0, %v1118_v6 }
 0x1ff   : > { %v1279_v10 = vpop.f32.mrf.mxu1  ;;  %1737 = vmatmul.msk.f32.gmra.mxu1 %vm880_vm0, %v1109_v9 }
 0x200   : > { %v1351_v33 = vmax.f32 %v1279_v10, 0.0 }
 0x202   : > { %1762 = vmatmul.msk.f32.gmra.mxu2 %vm880_vm0, %v1351_v33 }
 0x20d   : > { %v1081_v11 = vpop.f32.mrf.mxu3 }
 0x20e   : > { %v1119_v29 = vmax.f32 %v1081_v11, 0.0  ;;  %v1282_v12 = vpop.f32.mrf.mxu1 }
 0x20f   : > { %v1352_v14 = vmax.f32 %v1282_v12, 0.0  ;;  %v1054_v15 = vpop.f32.mrf.mxu0 }
 0x210   : > { %v1110_v16 = vmax.f32 %v1054_v15, 0.0  ;;  %1747 = vmatmul.msk.f32.gmra.mxu3 %vm880_vm0, %v1119_v29 }
 0x211   : > { %1763 = vmatmul.msk.f32.gmra.mxu2 %vm880_vm0, %v1352_v14 }
 0x212   : > { %1738 = vmatmul.msk.f32.gmra.mxu1 %vm880_vm0, %v1110_v16 }
 0x216   : > { %v1285_v1 = vpop.f32.mrf.mxu1 }
 0x217   : > { %v1353_v17 = vmax.f32 %v1285_v1, 0.0 }
 0x219   : > { %1764 = vmatmul.msk.f32.gmra.mxu2 %vm880_vm0, %v1353_v17 }
 0x21e   : > { %v1084_v8 = vpop.f32.mrf.mxu3 }
 0x21f   : > { %v1120_v18 = vmax.f32 %v1084_v8, 0.0 }
 0x220   : > { %v1492_v19 = vpop.f32.mrf.mxu2 }
 0x221   : > { %1589 = vst.msk [vmem:[%s2338_s9] sm:$0xff] %vm1588_vm1, %v1492_v19  ;;  %1748 = vmatmul.msk.f32.gmra.mxu3 %vm880_vm0, %v1120_v18 }
 0x227   : > { %v1057_v21 = vpop.f32.mrf.mxu0 }
 0x228   : > { %v1111_v22 = vmax.f32 %v1057_v21, 0.0  ;;  %v1495_v0 = vpop.f32.mrf.mxu2 }
 0x229   : > { %1590 = vst.msk [vmem:[%s2338_s9 + $0x8] sm:$0xff] %vm1588_vm1, %v1495_v0  ;;  %v1288_v23 = vpop.f32.mrf.mxu1 }
 0x22a   : > { %v1354_v24 = vmax.f32 %v1288_v23, 0.0  ;;  %1739 = vmatmul.msk.f32.gmra.mxu1 %vm880_vm0, %v1111_v22 }
 0x22c   : > { %1765 = vmatmul.msk.f32.gmra.mxu2 %vm880_vm0, %v1354_v24 }
 0x230   : > { %v1498_v25 = vpop.f32.mrf.mxu2 }
 0x231   : > { %1591 = vst.msk [vmem:[%s2338_s9 + $0x10] sm:$0xff] %vm1588_vm1, %v1498_v25 }
 0x235   : > { %v1087_v26 = vpop.f32.mrf.mxu3 }
 0x236   : > { %v1121_v27 = vmax.f32 %v1087_v26, 0.0 }
 0x238   : > { %1749 = vmatmul.msk.f32.gmra.mxu3 %vm880_vm0, %v1121_v27  ;;  %v1501_v28 = vpop.f32.mrf.mxu2 }
 0x239   : > { %1592 = vst.msk [vmem:[%s2338_s9 + $0x18] sm:$0xff] %vm1588_vm1, %v1501_v28 }
 0x23a   : > { %v1060_v30 = vpop.f32.mrf.mxu0 }
 0x23b   : > { %v1112_v48 = vmax.f32 %v1060_v30, 0.0 }
 0x23d   : > { %1740 = vmatmul.msk.f32.gmra.mxu1 %vm880_vm0, %v1112_v48  ;;  %v1315_v32 = vpop.f32.mrf.mxu3 }
 0x23e   : > { %v1363_v34 = vmax.f32 %v1315_v32, 0.0 }
 0x240   : > { %v1504_v35 = vpop.f32.mrf.mxu2  ;;  %1774 = vmatmul.msk.f32.vlgmr.msra.gmra.mxu3 %vm880_vm0, %v1363_v34 }
 0x241   : > { %1593 = vst.msk [vmem:[%s2338_s9 + $0x20] sm:$0xff] %vm1588_vm1, %v1504_v35  ;;  %v1291_v36 = vpop.f32.mrf.mxu1 }
 0x242   : > { %v1355_v37 = vmax.f32 %v1291_v36, 0.0  ;;  %v1063_v20 = vpop.f32.mrf.mxu0 }
 0x243   : > { %v1113_v38 = vmax.f32 %v1063_v20, 0.0 }
 0x244   : > { %1766 = vmatmul.msk.f32.gmra.mxu2 %vm880_vm0, %v1355_v37 }
 0x245   : > { %1741 = vmatmul.msk.f32.gmra.mxu1 %vm880_vm0, %v1113_v38  ;;  %v1318_v39 = vpop.f32.mrf.mxu3 }
 0x246   : > { %v1364_v43 = vmax.f32 %v1318_v39, 0.0 }
 0x248   : > { %v1507_v44 = vpop.f32.mrf.mxu2  ;;  %1775 = vmatmul.msk.f32.gmra.mxu3 %vm880_vm0, %v1364_v43 }
 0x249   : > { %1594 = vst.msk [vmem:[%s2338_s9 + $0x28] sm:$0xff] %vm1588_vm1, %v1507_v44 }
 0x250   : > { %v1510_v45 = vpop.f32.mrf.mxu2 }
 0x251   : > { %1595 = vst.msk [vmem:[%s2338_s9 + $0x30] sm:$0xff] %vm1588_vm1, %v1510_v45 }
 0x254   : > { %v1294_v13 = vpop.f32.mrf.mxu1 }
 0x255   : > { %v1356_v46 = vmax.f32 %v1294_v13, 0.0  ;;  %v1321_v49 = vpop.f32.mrf.mxu3 }
 0x256   : > { %v1365_v40 = vmax.f32 %v1321_v49, 0.0 }
 0x257   : > { %1767 = vmatmul.msk.f32.gmra.mxu2 %vm880_vm0, %v1356_v46 }
 0x258   : > { %v1513_v31 = vpop.f32.mrf.mxu2  ;;  %1776 = vmatmul.msk.f32.gmra.mxu3 %vm880_vm0, %v1365_v40 }
 0x259   : > { %1596 = vst.msk [vmem:[%s2338_s9 + $0x38] sm:$0xff] %vm1588_vm1, %v1513_v31 }
 0x261   : > { %v1516_v41 = vpop.f32.mrf.mxu2 }
 0x262   : > { %1597 = vst.msk [vmem:[%s2338_s9 + $0x40] sm:$0xff] %vm1588_vm1, %v1516_v41 }
 0x265   : > { %v1297_v50 = vpop.f32.mrf.mxu1 }
 0x266   : > { %v1357_v42 = vmax.f32 %v1297_v50, 0.0 }
 0x268   : > { %v1324_v51 = vpop.f32.mrf.mxu3  ;;  %1768 = vmatmul.msk.f32.gmra.mxu2 %vm880_vm0, %v1357_v42 }
 0x269   : > { %v1366_v52 = vmax.f32 %v1324_v51, 0.0  ;;  %v1519_v53 = vpop.f32.mrf.mxu2 }
 0x26a   : > { %1598 = vst.msk [vmem:[%s2338_s9 + $0x48] sm:$0xff] %vm1588_vm1, %v1519_v53 }
 0x26b   : > { %1777 = vmatmul.msk.f32.gmra.mxu3 %vm880_vm0, %v1366_v52 }
 0x274   : > { %v1522_v54 = vpop.f32.mrf.mxu2 }
 0x275   : > { %1599 = vst.msk [vmem:[%s2338_s9 + $0x50] sm:$0xff] %vm1588_vm1, %v1522_v54 }
 0x27c   : > { %v1300_v55 = vpop.f32.mrf.mxu1  ;;  %v1525_v56 = vpop.f32.mrf.mxu2 }
 0x27d   : > { %v1358_v57 = vmax.f32 %v1300_v55, 0.0  ;;  %1600 = vst.msk [vmem:[%s2338_s9 + $0x58] sm:$0xff] %vm1588_vm1, %v1525_v56 }
 0x27f   : > { %1769 = vmatmul.msk.f32.gmra.mxu2 %vm880_vm0, %v1358_v57 }
 0x280   : > { %v1327_v47 = vpop.f32.mrf.mxu3 }
 0x281   : > { %v1367_v58 = vmax.f32 %v1327_v47, 0.0 }
 0x283   : > { %1778 = vmatmul.msk.f32.gmra.mxu3 %vm880_vm0, %v1367_v58 }
 0x285   : > { %v1528_v59 = vpop.f32.mrf.mxu2 }
 0x286   : > { %1601 = vst.msk [vmem:[%s2338_s9 + $0x60] sm:$0xff] %vm1588_vm1, %v1528_v59 }
 0x28f   : > { %v1303_v60 = vpop.f32.mrf.mxu1 }
 0x290   : > { %v1359_v61 = vmax.f32 %v1303_v60, 0.0 }
 0x292   : > { %1770 = vmatmul.msk.f32.gmra.mxu2 %vm880_vm0, %v1359_v61 }
 0x293   : > { %v1330_v62 = vpop.f32.mrf.mxu3 }
 0x294   : > { %v1368_v63 = vmax.f32 %v1330_v62, 0.0  ;;  %v1531_v2 = vpop.f32.mrf.mxu2 }
 0x295   : > { %1602 = vst.msk [vmem:[%s2338_s9 + $0x68] sm:$0xff] %vm1588_vm1, %v1531_v2 }
 0x296   : > { %1779 = vmatmul.msk.f32.gmra.mxu3 %vm880_vm0, %v1368_v63 }
 0x29c   : > { %v1534_v3 = vpop.f32.mrf.mxu2 }
 0x29d   : > { %1603 = vst.msk [vmem:[%s2338_s9 + $0x70] sm:$0xff] %vm1588_vm1, %v1534_v3 }
 0x2a4   : > { %v1333_v4 = vpop.f32.mrf.mxu3 }
 0x2a5   : > { %v1369_v5 = vmax.f32 %v1333_v4, 0.0 }
 0x2a7   : > { %v1306_v6 = vpop.f32.mrf.mxu1  ;;  %1780 = vmatmul.msk.f32.gmra.mxu3 %vm880_vm0, %v1369_v5 }
 0x2a8   : > { %v1360_v7 = vmax.f32 %v1306_v6, 0.0 }
 0x2aa   : > { %1771 = vmatmul.msk.f32.gmra.mxu2 %vm880_vm0, %v1360_v7 }
 0x2af   : > { %v1537_v9 = vpop.f32.mrf.mxu2 }
 0x2b0   : > { %1604 = vst.msk [vmem:[%s2338_s9 + $0x78] sm:$0xff] %vm1588_vm1, %v1537_v9 }
 0x2ba   : > { %v1309_v10 = vpop.f32.mrf.mxu1 }
 0x2bb   : > { %v1361_v33 = vmax.f32 %v1309_v10, 0.0  ;;  %v1336_v11 = vpop.f32.mrf.mxu3 }
 0x2bc   : > { %v1370_v29 = vmax.f32 %v1336_v11, 0.0 }
 0x2bd   : > { %1772 = vmatmul.msk.f32.gmra.mxu2 %vm880_vm0, %v1361_v33 }
 0x2be   : > { %1781 = vmatmul.msk.f32.gmra.mxu3 %vm880_vm0, %v1370_v29 }
 0x2c2   : > { %v1312_v12 = vpop.f32.mrf.mxu1 }
 0x2c3   : > { %v1362_v14 = vmax.f32 %v1312_v12, 0.0  ;;  %v1564_v15 = vpop.f32.mrf.mxu3 }
 0x2c4   : > { %1613 = vst.msk [vmem:[%s2338_s9 + $0xc0] sm:$0xff] %vm1588_vm1, %v1564_v15 }
 0x2c5   : > { %1773 = vmatmul.msk.f32.gmra.mxu2 %vm880_vm0, %v1362_v14 }
 0x2c7   : > { %v1540_v16 = vpop.f32.mrf.mxu2 }
 0x2c8   : > { %1605 = vst.msk [vmem:[%s2338_s9 + $0x80] sm:$0xff] %vm1588_vm1, %v1540_v16 }
 0x2cb   : > { %v1567_v1 = vpop.f32.mrf.mxu3 }
 0x2cc   : > { %1614 = vst.msk [vmem:[%s2338_s9 + $0xc8] sm:$0xff] %vm1588_vm1, %v1567_v1 }
 0x2da   : > { %v1543_v17 = vpop.f32.mrf.mxu2 }
 0x2db   : > { %1606 = vst.msk [vmem:[%s2338_s9 + $0x88] sm:$0xff] %vm1588_vm1, %v1543_v17  ;;  %v1570_v8 = vpop.f32.mrf.mxu3 }
 0x2dc   : > { %1615 = vst.msk [vmem:[%s2338_s9 + $0xd0] sm:$0xff] %vm1588_vm1, %v1570_v8 }
 0x2eb   : > { %v1546_v18 = vpop.f32.mrf.mxu2 }
 0x2ec   : > { %1607 = vst.msk [vmem:[%s2338_s9 + $0x90] sm:$0xff] %vm1588_vm1, %v1546_v18 }
 0x2ee   : > { %v1573_v19 = vpop.f32.mrf.mxu3 }
 0x2ef   : > { %1616 = vst.msk [vmem:[%s2338_s9 + $0xd8] sm:$0xff] %vm1588_vm1, %v1573_v19 }
 0x302   : > { %v1549_v21 = vpop.f32.mrf.mxu2 }
 0x303   : > { %1608 = vst.msk [vmem:[%s2338_s9 + $0x98] sm:$0xff] %vm1588_vm1, %v1549_v21 }
 0x306   : > { %v1576_v22 = vpop.f32.mrf.mxu3 }
 0x307   : > { %1617 = vst.msk [vmem:[%s2338_s9 + $0xe0] sm:$0xff] %vm1588_vm1, %v1576_v22 }
 0x315   : > { %v1552_v0 = vpop.f32.mrf.mxu2 }
 0x316   : > { %1609 = vst.msk [vmem:[%s2338_s9 + $0xa0] sm:$0xff] %vm1588_vm1, %v1552_v0 }
 0x319   : > { %v1579_v23 = vpop.f32.mrf.mxu3 }
 0x31a   : > { %1618 = vst.msk [vmem:[%s2338_s9 + $0xe8] sm:$0xff] %vm1588_vm1, %v1579_v23 }
 0x32a   : > { %v1582_v24 = vpop.f32.mrf.mxu3 }
 0x32b   : > { %1619 = vst.msk [vmem:[%s2338_s9 + $0xf0] sm:$0xff] %vm1588_vm1, %v1582_v24 }
 0x32d   : > { %v1555_v25 = vpop.f32.mrf.mxu2 }
 0x32e   : > { %1610 = vst.msk [vmem:[%s2338_s9 + $0xa8] sm:$0xff] %vm1588_vm1, %v1555_v25 }
 0x340   : > { %v1558_v26 = vpop.f32.mrf.mxu2 }
 0x341   : > { %1611 = vst.msk [vmem:[%s2338_s9 + $0xb0] sm:$0xff] %vm1588_vm1, %v1558_v26  ;;  %v1585_v27 = vpop.f32.mrf.mxu3 }
 0x342   : > { %1620 = vst.msk [vmem:[%s2338_s9 + $0xf8] sm:$0xff] %vm1588_vm1, %v1585_v27 }
 0x348   : > { %v1561_v28 = vpop.f32.mrf.mxu2 }
 0x349   : > { %1612 = vst.msk [vmem:[%s2338_s9 + $0xb8] sm:$0xff] %vm1588_vm1, %v1561_v28 }
 0x34a PF: > { %s15_s18 = sadd.s32 1, %s1875_s18  }
 0x34b   : > { %p12_p4 = scmp.ge.s32.totalorder %s15_s18, 4  }
 0x34d   :  { %14 = sbr.rel (!%p12_p4) target bundleno = 1 (0x1), region = 70 }

</bundles_post_ra>
